<compile_context>
chip_gen: v7x
topology: tpu7x:2x2x1
jax: 0.10.0
libtpu: 0.0.40
codegen_flags: <defaults>
</compile_context>

<pallas_src>
import math
import functools
import jax
import jax.numpy as jnp
from jax.experimental import pallas as pl
from jax.experimental.pallas import tpu as pltpu

H = 128  # lane-dense padded hidden / output width


def _studentnet_kernel(x_ref, w_ref, b_ref, out_ref):
    # x_ref : (TM, D)        bf16 batch tile
    # w_ref : (D + 3*H, H)   bf16 packed, zero-padded weights (rows: D,H,H,H)
    # b_ref : (4, H)         f32 packed, zero-padded biases
    # out_ref: (TM, H)       f32 lane-dense output tile
    D = x_ref.shape[1]

    x = x_ref[...]                                                   # bf16

    h = jnp.dot(x, w_ref[0:D, :], preferred_element_type=jnp.float32)
    h = jnp.maximum(h + b_ref[0:1, :], 0.0)                          # (TM, 128) f32

    h = jnp.dot(h.astype(jnp.bfloat16), w_ref[D:D + H, :],
                preferred_element_type=jnp.float32)
    h = jnp.maximum(h + b_ref[1:2, :], 0.0)

    h = jnp.dot(h.astype(jnp.bfloat16), w_ref[D + H:D + 2 * H, :],
                preferred_element_type=jnp.float32)
    h = jnp.maximum(h + b_ref[2:3, :], 0.0)

    h = jnp.dot(h.astype(jnp.bfloat16), w_ref[D + 2 * H:D + 3 * H, :],
                preferred_element_type=jnp.float32)
    out_ref[...] = (h + b_ref[3:4, :]).astype(out_ref.dtype)


def pack_params(params, in_dim, act_dim):
    """Pack 4 (w, b) pairs into one bf16 weight slab + one f32 bias slab.

    Weights are stored (in_features, out_features); every layer's output is
    zero-padded to 128 lanes and every hidden layer's input rows to 128, so
    padded lanes carry exact zeros through ReLU and contribute nothing.
    """
    row_dims = [in_dim, H, H, H]
    w_blocks, b_blocks = [], []
    for i, (w, b) in enumerate(params):
        fan_in, fan_out = w.shape
        w_pad = jnp.zeros((row_dims[i], H), jnp.float32).at[:fan_in, :fan_out].set(w)
        b_pad = jnp.zeros((1, H), jnp.float32).at[:, :fan_out].set(b)
        w_blocks.append(w_pad)
        b_blocks.append(b_pad)
    w_packed = jnp.concatenate(w_blocks, axis=0).astype(jnp.bfloat16)  # (D+3H, 128)
    b_packed = jnp.concatenate(b_blocks, axis=0)                       # (4, 128) f32
    return w_packed, b_packed


@functools.partial(jax.jit, static_argnames=("act_dim",))
def studentnet_forward(obs, w_packed, b_packed, act_dim, state=None):
    """Mirrors StudentNet.forward: returns (logits, state)."""
    batch = obs.shape[0]
    x = obs.reshape(batch, -1).astype(jnp.bfloat16)  # obs.view(batch, -1), bf16
    D = x.shape[1]

    # Batch tile: a single full-extent block for small batches (exempt from the
    # (8,128) rule), 512-row tiles otherwise.  Sized well under v7x's 64 MiB
    # VMEM: 2 x (512*1024*2B) x-tiles + 2 x (512*128*4B) out-tiles + ~360 KiB
    # resident weights ~= 2.9 MiB.
    if batch <= 512:
        tm = batch
    else:
        tm = 512
    grid_m = pl.cdiv(batch, tm)

    flops = 2 * batch * (D * H + 3 * H * H)
    bytes_accessed = (x.size * 2 + int(w_packed.size) * 2
                      + int(b_packed.size) * 4 + batch * H * 4)

    logits_padded = pl.pallas_call(
        _studentnet_kernel,
        out_shape=jax.ShapeDtypeStruct((batch, H), jnp.float32),
        grid=(grid_m,),
        in_specs=[
            pl.BlockSpec((tm, D), lambda i: (i, 0)),             # batch tile
            pl.BlockSpec(w_packed.shape, lambda i: (0, 0)),      # VMEM-resident
            pl.BlockSpec(b_packed.shape, lambda i: (0, 0)),      # VMEM-resident
        ],
        out_specs=pl.BlockSpec((tm, H), lambda i: (i, 0)),
        compiler_params=pltpu.CompilerParams(
            dimension_semantics=("parallel",)),
        cost_estimate=pl.CostEstimate(
            flops=flops, bytes_accessed=bytes_accessed, transcendentals=0),
    )(x, w_packed, b_packed)

    return logits_padded[:, :act_dim], state


def init_params(key, in_dim, act_dim):
    """nn.Linear-style init: U(-1/sqrt(fan_in), 1/sqrt(fan_in)).

    Weights stored transposed relative to PyTorch: (in_features, out_features).
    Biases stored as (1, out_features).
    """
    dims = [in_dim, 32, 64, 32, act_dim]
    params = []
    for i in range(4):
        key, kw, kb = jax.random.split(key, 3)
        fan_in, fan_out = dims[i], dims[i + 1]
        bound = 1.0 / math.sqrt(fan_in)
        w = jax.random.uniform(kw, (fan_in, fan_out), jnp.float32, -bound, bound)
        b = jax.random.uniform(kb, (1, fan_out), jnp.float32, -bound, bound)
        params.append((w, b))
    return params


if __name__ == "__main__":
    key = jax.random.PRNGKey(0)

    # Small shapes consistent with the module: image-like observation,
    # discrete action space of size 6 (Qbert has 6 actions).
    batch = 2
    state_shape = (4, 16, 16)       # prod = 1024
    action_dim = 6
    in_dim = int(4 * 16 * 16)

    k_obs, k_params = jax.random.split(key)
    obs = jax.random.normal(k_obs, (batch,) + state_shape, dtype=jnp.float32)
    params = init_params(k_params, in_dim, action_dim)
    w_packed, b_packed = pack_params(params, in_dim, action_dim)

    logits, state = studentnet_forward(obs, w_packed, b_packed, action_dim,
                                       state=None)
    logits = jax.block_until_ready(logits)

    # Reference in plain JAX, mirroring the kernel's bf16-weight / f32-acc path.
    x = obs.reshape(batch, -1).astype(jnp.bfloat16)
    ref = x
    for i, (w, b) in enumerate(params):
        ref = jnp.dot(ref, w.astype(jnp.bfloat16),
                      preferred_element_type=jnp.float32) + b
        if i < 3:
            ref = jnp.maximum(ref, 0.0).astype(jnp.bfloat16)

    assert logits.shape == (batch, action_dim)
    assert jnp.allclose(logits, ref, atol=1e-2, rtol=1e-2)

    print("KERNEL_OK")
</pallas_src>

<mosaic_0001>
module attributes {stable_mosaic.version = 11 : i64} {
  func.func @_studentnet_kernel(%arg0: i32, %arg1: memref<2x1024xbf16, #tpu.memory_space<vmem>>, %arg2: memref<1408x128xbf16, #tpu.memory_space<vmem>>, %arg3: memref<4x128xf32, #tpu.memory_space<vmem>>, %arg4: memref<2x128xf32, #tpu.memory_space<vmem>>) attributes {dimension_semantics = [#tpu.dimension_semantics<parallel>], iteration_bounds = array<i64: 1>, scalar_prefetch = 0 : i64, scratch_operands = 0 : i64, tpu.core_type = #tpu.core_type<tc>, window_params = [{transform_indices = @transform_0, window_bounds = array<i64: 2, 1024>}, {pipeline_mode = #tpu.pipeline_mode<synchronous>, transform_indices = @transform_1, window_bounds = array<i64: 1408, 128>}, {pipeline_mode = #tpu.pipeline_mode<synchronous>, transform_indices = @transform_2, window_bounds = array<i64: 4, 128>}, {transform_indices = @transform_3, window_bounds = array<i64: 2, 128>}]} {
    %c0 = arith.constant 0 : index
    %c0_0 = arith.constant 0 : index
    %0 = vector.load %arg1[%c0, %c0_0] : memref<2x1024xbf16, #tpu.memory_space<vmem>>, vector<2x1024xbf16>
    %c0_1 = arith.constant 0 : index
    %c0_2 = arith.constant 0 : index
    %1 = vector.load %arg2[%c0_1, %c0_2] : memref<1408x128xbf16, #tpu.memory_space<vmem>>, vector<1024x128xbf16>
    %cst = arith.constant dense<0.000000e+00> : vector<2x128xf32>
    %2 = tpu.matmul %0, %1, %cst {dimension_numbers = #tpu.dot_dimension_numbers<[1], [0], [0], [1], [0, 0, 1, 1], [], []>} : vector<2x1024xbf16>, vector<1024x128xbf16>, vector<2x128xf32> -> vector<2x128xf32>
    %c0_3 = arith.constant 0 : index
    %c0_4 = arith.constant 0 : index
    %3 = vector.load %arg3[%c0_3, %c0_4] : memref<4x128xf32, #tpu.memory_space<vmem>>, vector<1x128xf32>
    %4 = vector.broadcast %3 : vector<1x128xf32> to vector<2x128xf32>
    %5 = arith.addf %2, %4 : vector<2x128xf32>
    %cst_5 = arith.constant 0.000000e+00 : f32
    %6 = vector.broadcast %cst_5 : f32 to vector<2x128xf32>
    %7 = arith.maximumf %5, %6 : vector<2x128xf32>
    %8 = arith.truncf %7 : vector<2x128xf32> to vector<2x128xbf16>
    %c1024 = arith.constant 1024 : index
    %c0_6 = arith.constant 0 : index
    %9 = vector.load %arg2[%c1024, %c0_6] : memref<1408x128xbf16, #tpu.memory_space<vmem>>, vector<128x128xbf16>
    %cst_7 = arith.constant dense<0.000000e+00> : vector<2x128xf32>
    %10 = tpu.matmul %8, %9, %cst_7 {dimension_numbers = #tpu.dot_dimension_numbers<[1], [0], [0], [1], [0, 0, 1, 1], [], []>} : vector<2x128xbf16>, vector<128x128xbf16>, vector<2x128xf32> -> vector<2x128xf32>
    %c1 = arith.constant 1 : index
    %c0_8 = arith.constant 0 : index
    %11 = vector.load %arg3[%c1, %c0_8] : memref<4x128xf32, #tpu.memory_space<vmem>>, vector<1x128xf32>
    %12 = vector.broadcast %11 : vector<1x128xf32> to vector<2x128xf32>
    %13 = arith.addf %10, %12 : vector<2x128xf32>
    %cst_9 = arith.constant 0.000000e+00 : f32
    %14 = vector.broadcast %cst_9 : f32 to vector<2x128xf32>
    %15 = arith.maximumf %13, %14 : vector<2x128xf32>
    %16 = arith.truncf %15 : vector<2x128xf32> to vector<2x128xbf16>
    %c1152 = arith.constant 1152 : index
    %c0_10 = arith.constant 0 : index
    %17 = vector.load %arg2[%c1152, %c0_10] : memref<1408x128xbf16, #tpu.memory_space<vmem>>, vector<128x128xbf16>
    %cst_11 = arith.constant dense<0.000000e+00> : vector<2x128xf32>
    %18 = tpu.matmul %16, %17, %cst_11 {dimension_numbers = #tpu.dot_dimension_numbers<[1], [0], [0], [1], [0, 0, 1, 1], [], []>} : vector<2x128xbf16>, vector<128x128xbf16>, vector<2x128xf32> -> vector<2x128xf32>
    %c2 = arith.constant 2 : index
    %c0_12 = arith.constant 0 : index
    %19 = vector.load %arg3[%c2, %c0_12] : memref<4x128xf32, #tpu.memory_space<vmem>>, vector<1x128xf32>
    %20 = vector.broadcast %19 : vector<1x128xf32> to vector<2x128xf32>
    %21 = arith.addf %18, %20 : vector<2x128xf32>
    %cst_13 = arith.constant 0.000000e+00 : f32
    %22 = vector.broadcast %cst_13 : f32 to vector<2x128xf32>
    %23 = arith.maximumf %21, %22 : vector<2x128xf32>
    %24 = arith.truncf %23 : vector<2x128xf32> to vector<2x128xbf16>
    %c1280 = arith.constant 1280 : index
    %c0_14 = arith.constant 0 : index
    %25 = vector.load %arg2[%c1280, %c0_14] : memref<1408x128xbf16, #tpu.memory_space<vmem>>, vector<128x128xbf16>
    %cst_15 = arith.constant dense<0.000000e+00> : vector<2x128xf32>
    %26 = tpu.matmul %24, %25, %cst_15 {dimension_numbers = #tpu.dot_dimension_numbers<[1], [0], [0], [1], [0, 0, 1, 1], [], []>} : vector<2x128xbf16>, vector<128x128xbf16>, vector<2x128xf32> -> vector<2x128xf32>
    %c3 = arith.constant 3 : index
    %c0_16 = arith.constant 0 : index
    %27 = vector.load %arg3[%c3, %c0_16] : memref<4x128xf32, #tpu.memory_space<vmem>>, vector<1x128xf32>
    %28 = vector.broadcast %27 : vector<1x128xf32> to vector<2x128xf32>
    %29 = arith.addf %26, %28 : vector<2x128xf32>
    %c0_17 = arith.constant 0 : index
    %c0_18 = arith.constant 0 : index
    %30 = vector.load %arg4[%c0_17, %c0_18] : memref<2x128xf32, #tpu.memory_space<vmem>>, vector<2x128xf32>
    tpu.vector_store %arg4[%c0_17, %c0_18], %29 {strides = array<i32>} : memref<2x128xf32, #tpu.memory_space<vmem>>, vector<2x128xf32>,
    return
  }
  func.func @transform_0(%arg0: i32) -> (i32, i32) {
    %c0_i32 = arith.constant 0 : i32
    %c0_i32_0 = arith.constant 0 : i32
    return %arg0, %c0_i32 : i32, i32
  }
  func.func @transform_1(%arg0: i32) -> (i32, i32) {
    %c0_i32 = arith.constant 0 : i32
    %c0_i32_0 = arith.constant 0 : i32
    %c0_i32_1 = arith.constant 0 : i32
    return %c0_i32, %c0_i32_0 : i32, i32
  }
  func.func @transform_2(%arg0: i32) -> (i32, i32) {
    %c0_i32 = arith.constant 0 : i32
    %c0_i32_0 = arith.constant 0 : i32
    %c0_i32_1 = arith.constant 0 : i32
    return %c0_i32, %c0_i32_0 : i32, i32
  }
  func.func @transform_3(%arg0: i32) -> (i32, i32) {
    %c0_i32 = arith.constant 0 : i32
    %c0_i32_0 = arith.constant 0 : i32
    return %arg0, %c0_i32 : i32, i32
  }
}

</mosaic_0001>

<bundles_post_ra>
// kernel: studentnet_forward.1
= control target key start
LH: loop header
LB: loop body
LE: loop exit
PB: predicated region body
PF: predicated region fallthrough
CT: control target
= control target key end

     0   :  { %8 = vsyncpa [#allocation3], 0  ;;  %s1635_s0 = inlined_call_operand.vmem [shape: bf16[2,1024], index: 0, kind: input, shape index: {}]   ;;  %s1636_s1 = inlined_call_operand.hbm [shape: bf16[1408,128], index: 1, kind: input, shape index: {}]   ;;  %s1637_s2 = inlined_call_operand.vmem [shape: f32[4,128], index: 2, kind: input, shape index: {}]   ;;  %s1638_s3 = inlined_call_operand.hbm [shape: f32[2,128], index: 3, kind: output, shape index: {}]  }
   0x1   :  { %9 = vsyncpa [#allocation4], 0  ;;  %s1526_s12 = smov [#allocation2]   ;;  %s1478_s16 = scalar_lea.hbm %s1636_s1, 11264 }
   0x2   :  { %s17_s13 = sshll.u32 %s1526_s12, 4  ;;  %p1479_p0 = scmp.ne.s32.totalorder %s1636_s1, %s1478_s16  ;;  %s18_s13 = int_to_ptr.vmem [resolvable:$true] %s17_s13 }
   0x3   :  { %p1482_p1 = scmp.lt.u32.totalorder %s1478_s16, %s1636_s1 }
   0x5   :  { %p1484_p2 = pnand %p1482_p1, %p1479_p0 }
   0x7   :  { %1487 = shalt.err (!%p1484_p2)
}
   0x8   :  { %s1488_s21 = scalar_lea.vmem %s18_s13, 11264  ;;  %p1493_p4 = scmp.lt.s32.totalorder %s18_s13, %s18_s13 }
   0x9   :  { %p1489_p3 = scmp.ne.s32.totalorder %s18_s13, %s1488_s21  ;;  %p1494_p5 = scmp.lt.s32.totalorder %s1488_s21, %s1488_s21 }
   0xb   :  { %p1495_p6 = por %p1494_p5, %p1493_p4 }
   0xd   :  { %p1496_p7 = pnand %p1495_p6, %p1489_p3 }
   0xf   :  { %1499 = shalt.err (!%p1496_p7)
}
  0x10   :  { %s1527_s22 = smov 64   ;;  %s1528_s23 = smov 4  }
  0x11   :  { %23 = dma.hbm_to_vmem [thread:$0]  %s1636_s1, 11264, %s18_s13, [#allocation3], %s1527_s22, %s1527_s22, %s1528_s23  }
  0x12   :  { %1522 = dma.done.wait [#allocation3], 11264  }
  0x13   :  { %1523 = vsyncadd [#allocation3], 4294956032  ;;  %v1389_v0 = vld [vmem:[#allocation2 + $0x40] sm:$0xff]   ;;  %v1393_v4 = vld [vmem:[#allocation2 + $0x48] sm:$0xff]   ;;  %v1529_v22 = vmov 1966171168   ;;  %v169_v24 = vlaneseq }
  0x14   :  { %v1390_v1 = vld [vmem:[#allocation2 + $0xc0] sm:$0xff]   ;;  %1207 = vmatprep.subr.bf16.mxu0 %v1389_v0  ;;  %v1394_v5 = vld [vmem:[#allocation2 + $0xc8] sm:$0xff]   ;;  %v1397_v8 = vld [vmem:[#allocation2 + $0x50] sm:$0xff]   ;;  %v167_v23 = vunpack.c.l.s4 %v1529_v22  ;;  %vm1531_vm0 = vmmov 0   ;;  %s1532_s7 = smov [#allocation5]  }
  0x15   :  { %v1391_v2 = vld [vmem:[#allocation2] sm:$0xff]   ;;  %1229 = vmatprep.subr.bf16.mxu1 %v1390_v1  ;;  %v1395_v6 = vld [vmem:[#allocation2 + $0x8] sm:$0xff]   ;;  %v1398_v9 = vld [vmem:[#allocation2 + $0xd0] sm:$0xff]   ;;  %v170_v30 = vshrl.u32 %v169_v24, 7  ;;  %s1106_s8 = sshll.u32 %s1532_s7, 4  ;;  %s1107_s8 = int_to_ptr.vmem [resolvable:$true] %s1106_s8 }
  0x16   :  { %v1392_v3 = vld [vmem:[#allocation2 + $0x80] sm:$0xff]   ;;  %1208 = vmatpush3.bf16.msra.mxu0 %v1391_v2  ;;  %v1396_v7 = vld [vmem:[#allocation2 + $0x88] sm:$0xff]   ;;  %v1399_v10 = vld [vmem:[#allocation2 + $0x10] sm:$0xff]   ;;  %v168_v29 = vunpack.c.0.s8 %v167_v23  ;;  %s1500_s9 = scalar_lea.vmem %s1107_s8, 32  ;;  %p1505_p9 = scmp.lt.s32.totalorder %s1107_s8, %s1107_s8 }
  0x17   :  { %1230 = vmatpush3.bf16.msra.mxu1 %v1392_v3  ;;  %1209 = vmatprep.subr.bf16.mxu0 %v1393_v4  ;;  %v1400_v11 = vld [vmem:[#allocation2 + $0x90] sm:$0xff]   ;;  %v1401_v12 = vld [vmem:[#allocation2 + $0x58] sm:$0xff]   ;;  %v1405_v16 = vld [vmem:[#allocation2 + $0x60] sm:$0xff]   ;;  %p1501_p8 = scmp.ne.s32.totalorder %s1107_s8, %s1500_s9  ;;  %p1506_p10 = scmp.lt.s32.totalorder %s1500_s9, %s1500_s9 }
  0x18   :  { %1231 = vmatprep.subr.bf16.mxu1 %v1394_v5  ;;  %v1402_v13 = vld [vmem:[#allocation2 + $0xd8] sm:$0xff]   ;;  %v1406_v17 = vld [vmem:[#allocation2 + $0xe0] sm:$0xff]   ;;  %v1409_v20 = vld [vmem:[#allocation2 + $0x68] sm:$0xff]   ;;  %v1565_v35 = vsub.s32 %v168_v29, %v170_v30 }
  0x19   :  { %v1403_v14 = vld [vmem:[#allocation2 + $0x18] sm:$0xff]   ;;  %v1407_v18 = vld [vmem:[#allocation2 + $0x20] sm:$0xff]   ;;  %v1410_v21 = vld [vmem:[#allocation2 + $0xe8] sm:$0xff]   ;;  %p1507_p11 = por %p1506_p10, %p1505_p9 }
  0x1a   :  { %1210 = vmatpush3.bf16.msra.mxu0 %v1395_v6  ;;  %v1404_v15 = vld [vmem:[#allocation2 + $0x98] sm:$0xff]   ;;  %v1408_v19 = vld [vmem:[#allocation2 + $0xa0] sm:$0xff]   ;;  %v1411_v25 = vld [vmem:[#allocation2 + $0x28] sm:$0xff]  }
  0x1b   :  { %1232 = vmatpush3.bf16.msra.mxu1 %v1396_v7  ;;  %1211 = vmatprep.subr.bf16.mxu0 %v1397_v8  ;;  %v1412_v26 = vld [vmem:[#allocation2 + $0xa8] sm:$0xff]   ;;  %v1413_v27 = vld [vmem:[#allocation2 + $0x70] sm:$0xff]   ;;  %v1417_v33 = vld [vmem:[#allocation2 + $0x78] sm:$0xff]   ;;  %p1508_p12 = pnand %p1507_p11, %p1501_p8 }
  0x1c   :  { %1233 = vmatprep.subr.bf16.mxu1 %v1398_v9  ;;  %v1414_v28 = vld [vmem:[#allocation2 + $0xf0] sm:$0xff]   ;;  %v1418_v34 = vld [vmem:[#allocation2 + $0xf8] sm:$0xff]   ;;  %v30_v38 = vld [vmem:[%s1635_s0] sm:$0xff] }
  0x1d   :  { %v1415_v31 = vld [vmem:[#allocation2 + $0x30] sm:$0xff]   ;;  %v1419_v36 = vld [vmem:[#allocation2 + $0x38] sm:$0xff]   ;;  %v165_v39 = vcombine.high %v30_v38, %v30_v38  ;;  %v172_v40 = vrot.slane %v30_v38, %v1565_v35  ;;  %v1422_v41 = vld [vmem:[#allocation2 + $0x140] sm:$0xff]  }
  0x1e   :  { %1212 = vmatpush3.bf16.msra.mxu0 %v1399_v10  ;;  %v1416_v32 = vld [vmem:[#allocation2 + $0xb0] sm:$0xff]   ;;  %v1420_v37 = vld [vmem:[#allocation2 + $0xb8] sm:$0xff]   ;;  %v1423_v42 = vld [vmem:[#allocation2 + $0x1c0] sm:$0xff]  }
  0x1f   :  { %1234 = vmatpush3.bf16.msra.mxu1 %v1400_v11  ;;  %1213 = vmatprep.subr.bf16.mxu0 %v1401_v12  ;;  %v180_v43 = vcombine.high %v172_v40, %v172_v40  ;;  %v188_v44 = vrot.slane %v172_v40, %v1565_v35  ;;  %v1573_v45 = vrot.slane %v165_v39, %v1565_v35  ;;  %v1424_v46 = vld [vmem:[#allocation2 + $0x100] sm:$0xff]   ;;  %v1426_v51 = vld [vmem:[#allocation2 + $0x148] sm:$0xff]   ;;  %v1430_v58 = vld [vmem:[#allocation2 + $0x150] sm:$0xff]  }
  0x20   :  { %1235 = vmatprep.subr.bf16.mxu1 %v1402_v13  ;;  %v1425_v48 = vld [vmem:[#allocation2 + $0x180] sm:$0xff]   ;;  %v1427_v53 = vld [vmem:[#allocation2 + $0x1c8] sm:$0xff]   ;;  %v1431_v59 = vld [vmem:[#allocation2 + $0x1d0] sm:$0xff]  }
  0x21   :  { %v202_v47 = vrot.slane %v180_v43, %v1565_v35  ;;  %v181_v49 = vcombine.high %v1573_v45, %v1573_v45  ;;  %v210_v50 = vcombine.high %v188_v44, %v188_v44  ;;  %v1428_v55 = vld [vmem:[#allocation2 + $0x108] sm:$0xff]   ;;  %v1432_v60 = vld [vmem:[#allocation2 + $0x110] sm:$0xff]   ;;  %v1434_v62 = vld [vmem:[#allocation2 + $0x158] sm:$0xff]  }
  0x22   :  { %1214 = vmatpush3.bf16.msra.mxu0 %v1403_v14  ;;  %v1429_v56 = vld [vmem:[#allocation2 + $0x188] sm:$0xff]   ;;  %v1433_v61 = vld [vmem:[#allocation2 + $0x190] sm:$0xff]   ;;  %v1435_v63 = vld [vmem:[#allocation2 + $0x1d8] sm:$0xff]  }
  0x23   :  { %1236 = vmatpush3.bf16.msra.mxu1 %v1404_v15  ;;  %1215 = vmatprep.subr.bf16.mxu0 %v1405_v16  ;;  %v212_v52 = vcombine.high %v202_v47, %v202_v47  ;;  %v209_v54 = vrot.slane %v181_v49, %v1565_v35  ;;  %v1436_v0 = vld [vmem:[#allocation2 + $0x118] sm:$0xff]   ;;  %v1438_v2 = vld [vmem:[#allocation2 + $0x160] sm:$0xff]   ;;  %v1442_v6 = vld [vmem:[#allocation2 + $0x168] sm:$0xff]  }
  0x24   :  { %1237 = vmatprep.subr.bf16.mxu1 %v1406_v17  ;;  %638 = vmatprep.mubr.bf16.mxu0 %v202_v47  ;;  %v1437_v1 = vld [vmem:[#allocation2 + $0x198] sm:$0xff]   ;;  %v1439_v3 = vld [vmem:[#allocation2 + $0x1e0] sm:$0xff]   ;;  %v1443_v7 = vld [vmem:[#allocation2 + $0x1e8] sm:$0xff]  }
  0x25   :  { %678 = vmatprep.mubr.bf16.mxu1 %v212_v52  ;;  %v213_v57 = vcombine.high %v209_v54, %v209_v54  ;;  %v1440_v4 = vld [vmem:[#allocation2 + $0x120] sm:$0xff]   ;;  %v1444_v8 = vld [vmem:[#allocation2 + $0x128] sm:$0xff]   ;;  %v1446_v10 = vld [vmem:[#allocation2 + $0x170] sm:$0xff]  }
  0x26   :  { %1216 = vmatpush3.bf16.msra.mxu0 %v1407_v18  ;;  %v1441_v5 = vld [vmem:[#allocation2 + $0x1a0] sm:$0xff]   ;;  %v1445_v9 = vld [vmem:[#allocation2 + $0x1a8] sm:$0xff]   ;;  %v1447_v11 = vld [vmem:[#allocation2 + $0x1f0] sm:$0xff]   ;;  %v195_v18 = vrot.slane %v1573_v45, %v1565_v35 }
  0x27   :  { %1238 = vmatpush3.bf16.msra.mxu1 %v1408_v19  ;;  %1217 = vmatprep.subr.bf16.mxu0 %v1409_v20  ;;  %v1448_v12 = vld [vmem:[#allocation2 + $0x130] sm:$0xff]   ;;  %v1450_v14 = vld [vmem:[#allocation2 + $0x178] sm:$0xff]   ;;  %v1454_v20 = vld [vmem:[#allocation2 + $0x200] sm:$0xff]  }
  0x28   :  { %1239 = vmatprep.subr.bf16.mxu1 %v1410_v21  ;;  %v1449_v13 = vld [vmem:[#allocation2 + $0x1b0] sm:$0xff]   ;;  %v1451_v15 = vld [vmem:[#allocation2 + $0x1f8] sm:$0xff]   ;;  %v211_v19 = vcombine.high %v195_v18, %v195_v18  ;;  %v1530_v21 = vmov 0.0   ;;  %v1455_v22 = vld [vmem:[#allocation2 + $0x208] sm:$0xff]  }
  0x29   :  { %v1452_v16 = vld [vmem:[#allocation2 + $0x138] sm:$0xff]   ;;  %v1456_v23 = vld [vmem:[#allocation2 + $0x210] sm:$0xff]   ;;  %v1462_v29 = vld [vmem:[#allocation2 + $0x240] sm:$0xff]  }
  0x2a   :  { %1218 = vmatpush3.bf16.msra.mxu0 %v1411_v25  ;;  %v1453_v17 = vld [vmem:[#allocation2 + $0x1b8] sm:$0xff]   ;;  %v1458_v25 = vld [vmem:[#allocation2 + $0x220] sm:$0xff]   ;;  %v1463_v30 = vld [vmem:[#allocation2 + $0x248] sm:$0xff]  }
  0x2b   :  { %1240 = vmatpush3.bf16.msra.mxu1 %v1412_v26  ;;  %1219 = vmatprep.subr.bf16.mxu0 %v1413_v27  ;;  %v1457_v24 = vld [vmem:[#allocation2 + $0x218] sm:$0xff]   ;;  %v1459_v26 = vld [vmem:[#allocation2 + $0x228] sm:$0xff]   ;;  %v1460_v27 = vld [vmem:[#allocation2 + $0x230] sm:$0xff]  }
  0x2c   :  { %1241 = vmatprep.subr.bf16.mxu1 %v1414_v28  ;;  %v1461_v28 = vld [vmem:[#allocation2 + $0x238] sm:$0xff]  }
  0x2e   :  { %1220 = vmatpush3.bf16.msra.mxu0 %v1415_v31  ;;  %v1464_v31 = vld [vmem:[#allocation2 + $0x250] sm:$0xff]  }
  0x2f   :  { %1242 = vmatpush3.bf16.msra.mxu1 %v1416_v32  ;;  %1221 = vmatprep.subr.bf16.mxu0 %v1417_v33  ;;  %v1465_v32 = vld [vmem:[#allocation2 + $0x258] sm:$0xff]   ;;  %v1466_v33 = vld [vmem:[#allocation2 + $0x260] sm:$0xff]  }
  0x30   :  { %1243 = vmatprep.subr.bf16.mxu1 %v1418_v34  ;;  %v1467_v34 = vld [vmem:[#allocation2 + $0x268] sm:$0xff]  }
  0x32   :  { %1222 = vmatpush3.bf16.msra.mxu0 %v1419_v36  ;;  %v1115_v36 = vld [vmem:[%s1637_s2] ss:$0 sm:$0xff] }
  0x33   :  { %1244 = vmatpush3.bf16.msra.mxu1 %v1420_v37  ;;  %1251 = vmatprep.subr.bf16.mxu0 %v1422_v41 }
  0x34   :  { %1273 = vmatprep.subr.bf16.mxu1 %v1423_v42 }
  0x35   :  { %639 = vmatmul.mubr.bf16.vlgmr.msra.gmra.mrb[0].mxu0 %v188_v44 }
  0x36   :  { %1252 = vmatpush3.bf16.msra.mxu0 %v1424_v46  ;;  %679 = vmatmul.mubr.bf16.vlgmr.msra.gmra.mrb[0].mxu1 %v210_v50 }
  0x37   :  { %1253 = vmatprep.subr.bf16.mxu0 %v1426_v51  ;;  %1274 = vmatpush3.bf16.msra.mxu1 %v1425_v48 }
  0x38   :  { %718 = vmatprep.mubr.bf16.mxu0 %v209_v54  ;;  %1275 = vmatprep.subr.bf16.mxu1 %v1427_v53 }
  0x39   :  { %758 = vmatprep.mubr.bf16.mxu1 %v213_v57 }
  0x3a   :  { %1254 = vmatpush3.bf16.msra.mxu0 %v1428_v55 }
  0x3b   :  { %1255 = vmatprep.subr.bf16.mxu0 %v1430_v58  ;;  %1276 = vmatpush3.bf16.msra.mxu1 %v1429_v56 }
  0x3c   :  { %1277 = vmatprep.subr.bf16.mxu1 %v1431_v59 }
  0x3e   :  { %1256 = vmatpush3.bf16.msra.mxu0 %v1432_v60 }
  0x3f   :  { %1257 = vmatprep.subr.bf16.mxu0 %v1434_v62  ;;  %1278 = vmatpush3.bf16.msra.mxu1 %v1433_v61  ;;  %v1468_v62 = vld [vmem:[#allocation2 + $0x270] sm:$0xff]  }
  0x40   :  { %1279 = vmatprep.subr.bf16.mxu1 %v1435_v63  ;;  %v1469_v63 = vld [vmem:[#allocation2 + $0x278] sm:$0xff]  }
  0x42   :  { %1258 = vmatpush3.bf16.msra.mxu0 %v1436_v0  ;;  %v1470_v0 = vld [vmem:[#allocation2 + $0x280] sm:$0xff]  }
  0x43   :  { %1259 = vmatprep.subr.bf16.mxu0 %v1438_v2  ;;  %1280 = vmatpush3.bf16.msra.mxu1 %v1437_v1  ;;  %v1471_v1 = vld [vmem:[#allocation2 + $0x288] sm:$0xff]   ;;  %v1472_v2 = vld [vmem:[#allocation2 + $0x290] sm:$0xff]  }
  0x44   :  { %1281 = vmatprep.subr.bf16.mxu1 %v1439_v3  ;;  %v1473_v3 = vld [vmem:[#allocation2 + $0x298] sm:$0xff]  }
  0x46   :  { %1260 = vmatpush3.bf16.msra.mxu0 %v1440_v4  ;;  %v1474_v4 = vld [vmem:[#allocation2 + $0x2a0] sm:$0xff]  }
  0x47   :  { %1261 = vmatprep.subr.bf16.mxu0 %v1442_v6  ;;  %1282 = vmatpush3.bf16.msra.mxu1 %v1441_v5  ;;  %v1475_v5 = vld [vmem:[#allocation2 + $0x2a8] sm:$0xff]   ;;  %v1180_v6 = vld [vmem:[%s1637_s2 + $0x1] ss:$0 sm:$0xff] }
  0x48   :  { %1283 = vmatprep.subr.bf16.mxu1 %v1443_v7 }
  0x4a   :  { %1262 = vmatpush3.bf16.msra.mxu0 %v1444_v8 }
  0x4b   :  { %1263 = vmatprep.subr.bf16.mxu0 %v1446_v10  ;;  %1284 = vmatpush3.bf16.msra.mxu1 %v1445_v9 }
  0x4c   :  { %1285 = vmatprep.subr.bf16.mxu1 %v1447_v11 }
  0x4e   :  { %1264 = vmatpush3.bf16.msra.mxu0 %v1448_v12 }
  0x4f   :  { %1265 = vmatprep.subr.bf16.mxu0 %v1450_v14  ;;  %1286 = vmatpush3.bf16.msra.mxu1 %v1449_v13  ;;  %v1476_v14 = vld [vmem:[#allocation2 + $0x2b0] sm:$0xff]  }
  0x50   :  { %1287 = vmatprep.subr.bf16.mxu1 %v1451_v15  ;;  %v1477_v15 = vld [vmem:[#allocation2 + $0x2b8] sm:$0xff]  }
  0x52   :  { %1266 = vmatpush3.bf16.msra.mxu0 %v1452_v16  ;;  %v1189_v16 = vld [vmem:[%s1637_s2 + $0x2] ss:$0 sm:$0xff] }
  0x53   :  { %1288 = vmatpush3.bf16.msra.mxu1 %v1453_v17  ;;  %1322 = vmatprep.subr.bf16.mxu0 %v1530_v21 }
  0x54   :  { %1342 = vmatprep.subr.bf16.mxu1 %v1530_v21 }
  0x55   :  { %719 = vmatmul.mubr.bf16.vlgmr.msra.gmra.mrb[4].mxu0 %v195_v18 }
  0x56   :  { %759 = vmatmul.mubr.bf16.vlgmr.msra.gmra.mrb[4].mxu1 %v211_v19  ;;  %1323 = vmatpush3.bf16.msra.mxu0 %v1454_v20 }
  0x57   :  { %1324 = vmatprep.subr.bf16.mxu0 %v1530_v21  ;;  %1338 = vmatprep.mubr.msk.bf16.mxu0 %vm1531_vm0, %v1530_v21 }
  0x58   :  { %1358 = vmatprep.mubr.msk.bf16.mxu1 %vm1531_vm0, %v1530_v21  ;;  %1343 = vmatpush3.bf16.msra.mxu1 %v1462_v29 }
  0x59   :  { %1344 = vmatprep.subr.bf16.mxu1 %v1530_v21 }
  0x5a   :  { %1325 = vmatpush3.bf16.msra.mxu0 %v1455_v22 }
  0x5b   :  { %1326 = vmatprep.subr.bf16.mxu0 %v1530_v21 }
  0x5c   :  { %1345 = vmatpush3.bf16.msra.mxu1 %v1463_v30 }
  0x5d   :  { %1346 = vmatprep.subr.bf16.mxu1 %v1530_v21 }
  0x5e   :  { %1327 = vmatpush3.bf16.msra.mxu0 %v1456_v23 }
  0x5f   :  { %1328 = vmatprep.subr.bf16.mxu0 %v1530_v21 }
  0x60   :  { %1347 = vmatpush3.bf16.msra.mxu1 %v1464_v31 }
  0x61   :  { %1348 = vmatprep.subr.bf16.mxu1 %v1530_v21 }
  0x62   :  { %1329 = vmatpush3.bf16.msra.mxu0 %v1457_v24 }
  0x63   :  { %1330 = vmatprep.subr.bf16.mxu0 %v1530_v21 }
  0x64   :  { %1349 = vmatpush3.bf16.msra.mxu1 %v1465_v32 }
  0x65   :  { %1350 = vmatprep.subr.bf16.mxu1 %v1530_v21 }
  0x66   :  { %1331 = vmatpush3.bf16.msra.mxu0 %v1458_v25  ;;  %v1198_v25 = vld [vmem:[%s1637_s2 + $0x3] ss:$0 sm:$0xff] }
  0x67   :  { %1332 = vmatprep.subr.bf16.mxu0 %v1530_v21 }
  0x68   :  { %1351 = vmatpush3.bf16.msra.mxu1 %v1466_v33 }
  0x69   :  { %1352 = vmatprep.subr.bf16.mxu1 %v1530_v21 }
  0x6a   :  { %1333 = vmatpush3.bf16.msra.mxu0 %v1459_v26 }
  0x6b   :  { %1334 = vmatprep.subr.bf16.mxu0 %v1530_v21 }
  0x6c   :  { %1353 = vmatpush3.bf16.msra.mxu1 %v1467_v34 }
  0x6d   :  { %1354 = vmatprep.subr.bf16.mxu1 %v1530_v21 }
  0x6e   :  { %1335 = vmatpush3.bf16.msra.mxu0 %v1460_v27 }
  0x6f   :  { %1336 = vmatprep.subr.bf16.mxu0 %v1530_v21 }
  0x70   :  { %1355 = vmatpush3.bf16.msra.mxu1 %v1468_v62 }
  0x71   :  { %1356 = vmatprep.subr.bf16.mxu1 %v1530_v21 }
  0x72   :  { %1337 = vmatpush3.bf16.msra.mxu0 %v1461_v28 }
  0x73   :  { %1362 = vmatprep.subr.bf16.mxu0 %v1530_v21 }
  0x74   :  { %1357 = vmatpush3.bf16.msra.mxu1 %v1469_v63 }
 0x108   :  { %v1223_v35 = vpop.f32.mrb[0].mxu0 }
 0x109   :  { %v1224_v37 = vpop.f32.mrb[1].mxu0  ;;  %v1245_v38 = vpop.f32.mrb[0].mxu1 }
 0x10a   :  { %v1225_v39 = vadd.f32 %v1224_v37, %v1223_v35  ;;  %v1226_v40 = vpop.f32.mrb[2].mxu0  ;;  %v1246_v41 = vpop.f32.mrb[1].mxu1 }
 0x10b   :  { %v1227_v42 = vpop.f32.mrb[3].mxu0  ;;  %v1247_v44 = vadd.f32 %v1246_v41, %v1245_v38  ;;  %v1248_v45 = vpop.f32.mrb[2].mxu1 }
 0x10c   :  { %v641_v43 = vadd.f32 %v1225_v39, %v1115_v36  ;;  %v1249_v46 = vpop.f32.mrb[3].mxu1 }
 0x10e   :  { %v681_v47 = vadd.f32 %v1247_v44, %v641_v43 }
 0x128   :  { %v1267_v48 = vpop.f32.mrb[4].mxu0 }
 0x129   :  { %v1268_v49 = vpop.f32.mrb[5].mxu0  ;;  %v1289_v50 = vpop.f32.mrb[4].mxu1 }
 0x12a   :  { %v1269_v51 = vadd.f32 %v1268_v49, %v1267_v48  ;;  %v1270_v52 = vpop.f32.mrb[6].mxu0  ;;  %v1290_v53 = vpop.f32.mrb[5].mxu1 }
 0x12b   :  { %v1271_v54 = vpop.f32.mrb[7].mxu0  ;;  %v1291_v56 = vadd.f32 %v1290_v53, %v1289_v50  ;;  %v1292_v57 = vpop.f32.mrb[6].mxu1 }
 0x12c   :  { %v721_v55 = vadd.f32 %v1269_v51, %v681_v47  ;;  %v1293_v58 = vpop.f32.mrb[7].mxu1 }
 0x12e   :  { %v761_v59 = vadd.f32 %v1291_v56, %v721_v55 }
 0x130   :  { %v766_v60 = vmax.f32 %v761_v59, 0.0 }
 0x132   :  { %v767_v61 = vpack.c.bf16 %v766_v60, %v766_v60 }
 0x134   :  { %1339 = vmatmul.mubr.bf16.vlgmr.msra.gmra.mrb[8].mxu0 %v767_v61 }
 0x135   :  { %1378 = vmatprep.mubr.msk.bf16.mxu0 %vm1531_vm0, %v1530_v21  ;;  %1363 = vmatpush3.bf16.msra.mxu0 %v1470_v0 }
 0x136   :  { %1364 = vmatprep.subr.bf16.mxu0 %v1530_v21 }
 0x139   :  { %1365 = vmatpush3.bf16.msra.mxu0 %v1471_v1 }
 0x13a   :  { %1366 = vmatprep.subr.bf16.mxu0 %v1530_v21 }
 0x13d   :  { %1367 = vmatpush3.bf16.msra.mxu0 %v1472_v2 }
 0x13e   :  { %1368 = vmatprep.subr.bf16.mxu0 %v1530_v21 }
 0x141   :  { %1369 = vmatpush3.bf16.msra.mxu0 %v1473_v3 }
 0x142   :  { %1370 = vmatprep.subr.bf16.mxu0 %v1530_v21 }
 0x145   :  { %1371 = vmatpush3.bf16.msra.mxu0 %v1474_v4 }
 0x146   :  { %1372 = vmatprep.subr.bf16.mxu0 %v1530_v21 }
 0x149   :  { %1373 = vmatpush3.bf16.msra.mxu0 %v1475_v5 }
 0x14a   :  { %1374 = vmatprep.subr.bf16.mxu0 %v1530_v21 }
 0x14d   :  { %1375 = vmatpush3.bf16.msra.mxu0 %v1476_v14 }
 0x14e   :  { %1376 = vmatprep.subr.bf16.mxu0 %v1530_v21 }
 0x151   :  { %1377 = vmatpush3.bf16.msra.mxu0 %v1477_v15 }
 0x207   :  { %v871_v7 = vpop.f32.mrb[8].mxu0 }
 0x208   :  { %v872_v8 = vadd.f32 %v1180_v6, %v871_v7  ;;  %v1340_v9 = vpop.f32.mrb[9].mxu0 }
 0x209   :  { %v874_v10 = vpop.f32.mrb[10].mxu0 }
 0x20a   :  { %v877_v11 = vmax.f32 %v872_v8, 0.0  ;;  %v1341_v12 = vpop.f32.mrb[11].mxu0 }
 0x20c   :  { %v878_v13 = vpack.c.bf16 %v877_v11, %v877_v11 }
 0x20e   :  { %1359 = vmatmul.mubr.bf16.vlgmr.msra.gmra.mrb[8].mxu1 %v878_v13 }
 0x2e1   :  { %v982_v17 = vpop.f32.mrb[8].mxu1 }
 0x2e2   :  { %v983_v18 = vadd.f32 %v1189_v16, %v982_v17  ;;  %v1360_v19 = vpop.f32.mrb[9].mxu1 }
 0x2e3   :  { %v985_v20 = vpop.f32.mrb[10].mxu1 }
 0x2e4   :  { %v988_v22 = vmax.f32 %v983_v18, 0.0  ;;  %v1361_v23 = vpop.f32.mrb[11].mxu1 }
 0x2e6   :  { %v989_v24 = vpack.c.bf16 %v988_v22, %v988_v22 }
 0x2e8   :  { %1379 = vmatmul.mubr.bf16.vlgmr.msra.gmra.mrb[12].mxu0 %v989_v24 }
 0x3bb   :  { %v1093_v21 = vpop.f32.mrb[12].mxu0 }
 0x3bc   :  { %v1094_v26 = vadd.f32 %v1198_v25, %v1093_v21  ;;  %v1380_v27 = vpop.f32.mrb[13].mxu0 }
 0x3bd   :  { %v1096_v28 = vpop.f32.mrb[14].mxu0 }
 0x3be   :  { %1099 = vst [vmem:[#allocation5] sm:$0x3] %v1094_v26  ;;  %v1381_v29 = vpop.f32.mrb[15].mxu0 }
 0x3bf   :  { %1511 = shalt.err (!%p1508_p12)
}
 0x3c0   :  { %s1512_s2 = scalar_lea.hbm %s1638_s3, 32 }
 0x3c1   :  { %p1513_p13 = scmp.ne.s32.totalorder %s1638_s3, %s1512_s2  ;;  %p1516_p0 = scmp.lt.u32.totalorder %s1512_s2, %s1638_s3 }
 0x3c3   :  { %p1518_p1 = pnand %p1516_p0, %p1513_p13 }
 0x3c5   :  { %1521 = shalt.err (!%p1518_p1)
}
 0x3c6   :  { %1109 = dma.vmem_to_hbm [thread:$0]  %s1107_s8, 32, %s1638_s3, [#allocation4]  }
 0x3c7   :  { %1524 = dma.done.wait [#allocation4], 32  }
 0x3c8   :  { %1525 = vsyncadd [#allocation4], 4294967264 }
 0x3c9   :  { %1113 = vsyncpa [#allocation3], 1 }
 0x3ca   :  { %1114 = vsyncpa [#allocation4], 1 }

</bundles_post_ra>
